<compile_context>
chip_gen: v6e
topology: v6e:2x2x1
jax: 0.10.0
libtpu: 0.0.40
codegen_flags: <defaults>
</compile_context>

<pallas_src>
import jax
import jax.numpy as jnp
from jax.experimental import pallas as pl
from jax.experimental.pallas import tpu as pltpu

IN_FEATURES = 512
OUT_FEATURES = 1

# Default batch tile: 4096 rows * 512 feats * 4 B = 8 MiB per x buffer (16 MiB double
# buffered) + ~4 MiB lane-padded output double buffer ~= 20 MiB, under the 32 MiB
# vmem_limit_bytes we request explicitly below (fits v5e/v6e/v7x).
TB_DEFAULT = 4096

VMEM_LIMIT_BYTES = 32 << 20  # explicit: v5e default scoped VMEM (16 MiB) is too small for TB=4096


def _fc_sigmoid_kernel(x_ref, w_ref, b_ref, o_ref):
    # x_ref: (TB, 512) VMEM (f32 or bf16); w_ref: (1, 512) VMEM f32;
    # b_ref: (1, 1) SMEM f32; o_ref: (TB, 1) VMEM f32.
    xf = x_ref[...].astype(jnp.float32)               # VPU cast (free under the tile DMA)
    wf = w_ref[...].astype(jnp.float32)               # (1, 512) broadcast row
    z = jnp.sum(xf * wf, axis=-1, keepdims=True)      # VPU multiply + XLU lane reduce, f32 acc
    z = z + b_ref[0, 0]                               # SMEM scalar bias
    o_ref[...] = jax.nn.sigmoid(z).astype(o_ref.dtype)  # EUP exp/recip


def binary_classifier_forward(x, weight, bias, *, tb=TB_DEFAULT):
    """sigmoid(x @ weight.T + bias).

    x:      (B, 512) -- streamed in its existing dtype (f32 or bf16); no wrapper cast.
    weight: (1, 512) -- PyTorch nn.Linear layout (out_features, in_features)
    bias:   (1,)
    Returns (B, 1) float32.
    """
    B = x.shape[0]
    assert x.shape[1] == IN_FEATURES
    assert weight.shape == (OUT_FEATURES, IN_FEATURES)

    # Weight stays in its natural lane-dense (1, 512) row layout; bias -> SMEM scalar.
    w_row = weight.astype(jnp.float32).reshape(OUT_FEATURES, IN_FEATURES)
    b2d = bias.astype(jnp.float32).reshape(1, 1)

    # Batch tile selection.
    if B <= 8:
        tb = B  # single full-extent block (allowed even when B isn't a multiple of 8)
    else:
        tb = max(8, (min(tb, B) // 8) * 8)
        if tb >= B:
            # Guarantee >= 2 grid steps so v7x's two TensorCores both get work.
            tb = max(8, ((pl.cdiv(B, 2) + 7) // 8) * 8)
    grid = (pl.cdiv(B, tb),)

    itemsize = jnp.dtype(x.dtype).itemsize
    cost = pl.CostEstimate(
        flops=2 * B * IN_FEATURES * OUT_FEATURES,
        transcendentals=B * OUT_FEATURES,
        bytes_accessed=(B * IN_FEATURES * itemsize
                        + IN_FEATURES * OUT_FEATURES * 4
                        + B * OUT_FEATURES * 4),
    )

    return pl.pallas_call(
        _fc_sigmoid_kernel,
        out_shape=jax.ShapeDtypeStruct((B, OUT_FEATURES), jnp.float32),
        grid_spec=pltpu.PrefetchScalarGridSpec(
            num_scalar_prefetch=0,
            grid=grid,
            in_specs=[
                pl.BlockSpec((tb, IN_FEATURES), lambda i: (i, 0)),                # streamed x tiles
                pl.BlockSpec((OUT_FEATURES, IN_FEATURES), lambda i: (0, 0)),      # resident (1,512) weight
                pl.BlockSpec(memory_space=pltpu.MemorySpace.SMEM),                # bias scalar
            ],
            out_specs=pl.BlockSpec((tb, OUT_FEATURES), lambda i: (i, 0)),
        ),
        compiler_params=pltpu.CompilerParams(
            dimension_semantics=("parallel",),       # rows independent; v7x's 2 TCs shard the grid
            vmem_limit_bytes=VMEM_LIMIT_BYTES,       # explicit budget valid on v5e/v6e/v7x
        ),
        cost_estimate=cost,
    )(x, w_row, b2d)


if __name__ == "__main__":
    key = jax.random.PRNGKey(0)
    kx, kw, kb = jax.random.split(key, 3)

    B = 8  # small batch
    bound = 1.0 / (IN_FEATURES ** 0.5)  # mimics nn.Linear uniform init bound
    x = jax.random.normal(kx, (B, IN_FEATURES), dtype=jnp.float32)
    weight = jax.random.uniform(kw, (OUT_FEATURES, IN_FEATURES),
                                minval=-bound, maxval=bound, dtype=jnp.float32)
    bias = jax.random.uniform(kb, (OUT_FEATURES,),
                              minval=-bound, maxval=bound, dtype=jnp.float32)

    def reference(xv):
        return jax.nn.sigmoid(xv.astype(jnp.float32) @ weight.T + bias.reshape(1, 1))

    # 1) f32, single full-batch tile.
    out = jax.block_until_ready(binary_classifier_forward(x, weight, bias))
    assert out.shape == (B, OUT_FEATURES)
    assert jnp.allclose(out, reference(x), atol=1e-5, rtol=1e-5), "f32 mismatch vs reference"

    # 2) f32, tiled batch with a padded tail (exercises grid pipelining + masked writeback).
    B2 = 20
    x2 = jax.random.normal(jax.random.PRNGKey(1), (B2, IN_FEATURES), dtype=jnp.float32)
    out2 = jax.block_until_ready(binary_classifier_forward(x2, weight, bias, tb=8))
    assert out2.shape == (B2, OUT_FEATURES)
    assert jnp.allclose(out2, reference(x2), atol=1e-5, rtol=1e-5), "tiled mismatch vs reference"

    # 3) bf16 x supplied by the "producer" (no wrapper-side cast) -> loose tolerance.
    x_bf16 = x.astype(jnp.bfloat16)
    out3 = jax.block_until_ready(binary_classifier_forward(x_bf16, weight, bias))
    assert out3.shape == (B, OUT_FEATURES)
    assert jnp.allclose(out3, reference(x), atol=1e-2), "bf16 mismatch vs reference"

    # 4) Medium batch that exercises the ">= 2 grid steps when B <= TB" split (v7x megacore path).
    B4 = 256
    x4 = jax.random.normal(jax.random.PRNGKey(2), (B4, IN_FEATURES), dtype=jnp.float32)
    out4 = jax.block_until_ready(binary_classifier_forward(x4, weight, bias))
    assert out4.shape == (B4, OUT_FEATURES)
    assert jnp.allclose(out4, reference(x4), atol=1e-5, rtol=1e-5), "split-grid mismatch vs reference"

    print("KERNEL_OK")
</pallas_src>

<mosaic_0001>
module attributes {stable_mosaic.version = 11 : i64} {
  func.func @_fc_sigmoid_kernel(%arg0: i32, %arg1: memref<8x512xf32, #tpu.memory_space<vmem>>, %arg2: memref<1x512xf32, #tpu.memory_space<vmem>>, %arg3: memref<1x1xf32, #tpu.memory_space<smem>>, %arg4: memref<8x1xf32, #tpu.memory_space<vmem>>) attributes {dimension_semantics = [#tpu.dimension_semantics<parallel>], iteration_bounds = array<i64: 1>, scalar_prefetch = 0 : i64, scratch_operands = 0 : i64, tpu.core_type = #tpu.core_type<tc>, window_params = [{transform_indices = @transform_0, window_bounds = array<i64: 8, 512>}, {pipeline_mode = #tpu.pipeline_mode<synchronous>, transform_indices = @transform_1, window_bounds = array<i64: 1, 512>}, {transform_indices = @transform_2, window_bounds = array<i64: 1, 1>}, {transform_indices = @transform_3, window_bounds = array<i64: 8, 1>}]} {
    %c0 = arith.constant 0 : index
    %c0_0 = arith.constant 0 : index
    %0 = vector.load %arg1[%c0, %c0_0] : memref<8x512xf32, #tpu.memory_space<vmem>>, vector<8x512xf32>
    %c0_1 = arith.constant 0 : index
    %c0_2 = arith.constant 0 : index
    %1 = vector.load %arg2[%c0_1, %c0_2] : memref<1x512xf32, #tpu.memory_space<vmem>>, vector<1x512xf32>
    %2 = vector.broadcast %1 : vector<1x512xf32> to vector<8x512xf32>
    %3 = arith.mulf %0, %2 : vector<8x512xf32>
    %cst = arith.constant dense<0.000000e+00> : vector<8xf32>
    %4 = vector.multi_reduction <add>, %3, %cst [1] : vector<8x512xf32> to vector<8xf32>
    %5 = vector.shape_cast %4 : vector<8xf32> to vector<8x1xf32>
    %c0_3 = arith.constant 0 : index
    %c0_4 = arith.constant 0 : index
    %6 = memref.load %arg3[%c0_3, %c0_4] : memref<1x1xf32, #tpu.memory_space<smem>>
    %7 = vector.broadcast %6 : f32 to vector<8x1xf32>
    %8 = arith.addf %5, %7 : vector<8x1xf32>
    %9 = arith.negf %8 : vector<8x1xf32>
    %10 = math.exp %9 : vector<8x1xf32>
    %cst_5 = arith.constant 1.000000e+00 : f32
    %11 = vector.broadcast %cst_5 : f32 to vector<8x1xf32>
    %12 = arith.addf %11, %10 : vector<8x1xf32>
    %13 = arith.divf %11, %12 : vector<8x1xf32>
    %c0_6 = arith.constant 0 : index
    %c0_7 = arith.constant 0 : index
    %14 = vector.load %arg4[%c0_6, %c0_7] : memref<8x1xf32, #tpu.memory_space<vmem>>, vector<8x1xf32>
    tpu.vector_store %arg4[%c0_6, %c0_7], %13 {strides = array<i32>} : memref<8x1xf32, #tpu.memory_space<vmem>>, vector<8x1xf32>,
    return
  }
  func.func @transform_0(%arg0: i32) -> (i32, i32) {
    %c0_i32 = arith.constant 0 : i32
    %c0_i32_0 = arith.constant 0 : i32
    return %arg0, %c0_i32 : i32, i32
  }
  func.func @transform_1(%arg0: i32) -> (i32, i32) {
    %c0_i32 = arith.constant 0 : i32
    %c0_i32_0 = arith.constant 0 : i32
    %c0_i32_1 = arith.constant 0 : i32
    return %c0_i32, %c0_i32_0 : i32, i32
  }
  func.func @transform_2(%arg0: i32) -> (i32, i32) {
    %c0_i32 = arith.constant 0 : i32
    %c0_i32_0 = arith.constant 0 : i32
    %c0_i32_1 = arith.constant 0 : i32
    return %c0_i32, %c0_i32_0 : i32, i32
  }
  func.func @transform_3(%arg0: i32) -> (i32, i32) {
    %c0_i32 = arith.constant 0 : i32
    %c0_i32_0 = arith.constant 0 : i32
    return %arg0, %c0_i32 : i32, i32
  }
}

</mosaic_0001>

<bundles_post_ra>
// kernel: tpu_custom_call.1
= control target key start
LH: loop header
LB: loop body
LE: loop exit
PB: predicated region body
PF: predicated region fallthrough
CT: control target
= control target key end

     0   :  { %9 = vsyncpa [#allocation4], 0  ;;  %s176_s0 = inlined_call_operand.hbm [shape: f32[8,512], index: 0, kind: input, shape index: {}]   ;;  %s177_s1 = inlined_call_operand.hbm [shape: f32[1,512], index: 1, kind: input, shape index: {}]   ;;  %s178_s2 = inlined_call_operand.<no memory space> [shape: f32[1,1], index: 2, kind: input, shape index: {}]   ;;  %s179_s3 = inlined_call_operand.vmem [shape: f32[8,1], index: 3, kind: output, shape index: {}]  }
   0x1   :  { %10 = vsyncpa [#allocation6], 0  ;;  %s142_s12 = smov [#allocation3]   ;;  %s143_s14 = smov [#allocation5]  }
   0x2   :  { %s17_s13 = sshll.u32 %s142_s12, 4  ;;  %s27_s15 = sshll.u32 %s143_s14, 4  ;;  %s18_s13 = int_to_ptr.vmem [resolvable:$true] %s17_s13  ;;  %s28_s15 = int_to_ptr.vmem [resolvable:$true] %s27_s15 }
   0x3   :  { %s106_s16 = scalar_lea.vmem %s18_s13, 512  ;;  %p111_p1 = scmp.lt.s32.totalorder %s18_s13, %s18_s13 }
   0x4   :  { %p107_p0 = scmp.ne.s32.totalorder %s18_s13, %s106_s16  ;;  %p112_p2 = scmp.lt.s32.totalorder %s106_s16, %s106_s16 }
   0x6   :  { %p113_p3 = por %p112_p2, %p111_p1 }
   0x8   :  { %p114_p4 = pnand %p113_p3, %p107_p0 }
   0xa   :  { %117 = shalt.err (!%p114_p4)
}
   0xb   :  { %20 = dma.hbm_to_vmem [thread:$0]  %s176_s0, 512, %s18_s13, [#allocation4]  }
   0xc   :  { %s126_s19 = scalar_lea.vmem %s28_s15, 64  ;;  %p131_p6 = scmp.lt.s32.totalorder %s28_s15, %s28_s15 }
   0xd   :  { %p127_p5 = scmp.ne.s32.totalorder %s28_s15, %s126_s19  ;;  %p132_p7 = scmp.lt.s32.totalorder %s126_s19, %s126_s19 }
   0xf   :  { %p133_p8 = por %p132_p7, %p131_p6 }
  0x11   :  { %p134_p9 = pnand %p133_p8, %p127_p5 }
  0x13   :  { %137 = shalt.err (!%p134_p9)
}
  0x14   :  { %30 = dma.hbm_to_vmem [thread:$0]  %s177_s1, 64, %s28_s15, [#allocation6]  }
  0x15   :  { %138 = dma.done.wait [#allocation4], 512  }
  0x16   :  { %139 = vsyncadd [#allocation4], 4294966784 }
  0x17   :  { %140 = dma.done.wait [#allocation6], 64  }
  0x18   :  { %141 = vsyncadd [#allocation6], 4294967232  ;;  %v45_v0 = vlaneseq  ;;  %v39_v6 = vld [vmem:[#allocation3] sm:$0xff]  ;;  %v40_v7 = vld [vmem:[#allocation3 + $0x8] sm:$0xff]  ;;  %v75_v22 = vstv %s178_s2  ;;  %vm83_vm0 = vcmask 7168  }
  0x19   :  { %v41_v8 = vld [vmem:[#allocation3 + $0x10] sm:$0xff]  ;;  %v43_v9 = vld [vmem:[#allocation5] sm:$0xf]  ;;  %v42_v14 = vld [vmem:[#allocation3 + $0x18] sm:$0xff] }
  0x1a   :  { %v46_v1 = vshrl.u32 %v45_v0, 7 }
  0x1c   :  { %v47_v2 = vsub.s32 0, %v46_v1  ;;  %v51_v3 = vsub.s32 1, %v46_v1  ;;  %v55_v4 = vsub.s32 2, %v46_v1  ;;  %v59_v5 = vsub.s32 3, %v46_v1 }
  0x1e   :  { %v48_v10 = vrot.slane %v43_v9, %v47_v2  ;;  %v52_v11 = vrot.slane %v43_v9, %v51_v3  ;;  %v56_v12 = vrot.slane %v43_v9, %v55_v4  ;;  %v60_v13 = vrot.slane %v43_v9, %v59_v5 }
  0x20   :  { %v65_v15 = vmul.f32 %v48_v10, %v39_v6  ;;  %v66_v16 = vmul.f32 %v52_v11, %v40_v7  ;;  %v67_v17 = vmul.f32 %v56_v12, %v41_v8  ;;  %v68_v18 = vmul.f32 %v60_v13, %v42_v14 }
  0x22   :  { %v69_v19 = vadd.f32 %v66_v16, %v65_v15 }
  0x24   :  { %v70_v20 = vadd.f32 %v69_v19, %v67_v17 }
  0x26   :  { %v71_v21 = vadd.f32 %v70_v20, %v68_v18 }
  0x28   :  { %72 = vadd.xlane.f32.xlu0 %v71_v21 }
  0xb1   :  { %v73_v23 = vpop.xlane.xlu0 %72 }
  0xb2   :  { %v76_v24 = vadd.f32 %v75_v22, %v73_v23 }
  0xb4   :  { %v91_v25 = vmul.f32 -1.442695, %v76_v24 }
  0xb6   :  { %94 = vpow2.f32 %v91_v25 }
  0xc3   :  { %v95_v26 = vpop.eup %94 }
  0xc4   :  { %v80_v27 = vadd.f32 1.0, %v95_v26 }
  0xc6   :  { %96 = vrcp.f32 %v80_v27 }
  0xd3   :  { %v97_v28 = vpop.eup %96 }
  0xd4   :  { %84 = vst.msk [vmem:[%s179_s3] sm:$0xff] %vm83_vm0, %v97_v28 }
  0xd5   :  { %89 = vsyncpa [#allocation4], 1 }
  0xd6   :  { %90 = vsyncpa [#allocation6], 1 }

</bundles_post_ra>
